<compile_context>
chip_gen: v7x
topology: tpu7x:2x2x1
jax: 0.10.0
libtpu: 0.0.40
codegen_flags: <defaults>
</compile_context>

<pallas_src>
import functools

import numpy as np
import jax
import jax.numpy as jnp
from jax.experimental import pallas as pl
from jax.experimental.pallas import tpu as pltpu


# ---------------- small config ----------------
BATCH = 2
SEQ = 8
D_MODEL = 128          # lane-aligned (multiple of 128) so every vreg is full
NORM_EPS = 1e-5
MAX_ROW_TILE = 512     # rows per grid step for large B*S


# ---------------- kernel ----------------
def adaln_final_kernel(x_ref, emb_ref, w_ref, b_ref, g_ref, out_ref, *, eps):
    D = x_ref.shape[-1]

    x = x_ref[...]                                   # (Rt, D) f32
    e = emb_ref[...]                                 # (Rt, D) f32

    # SiLU on the conditioning embedding (VPU mul + EUP sigmoid, f32).
    act = e * jax.nn.sigmoid(e)

    # Single MXU matmul per tile: (Rt, D) @ (D, 2D) -> lane-dense (Rt, 2D).
    proj = jnp.dot(act, w_ref[...],
                   preferred_element_type=jnp.float32) + b_ref[...]
    scale = proj[:, :D]                              # torch.chunk: first half
    shift = proj[:, D:]                              # second half

    # RMSNorm(x) with learnable weight (see TODO above).
    ms = jnp.mean(x * x, axis=-1, keepdims=True)
    xn = x * jax.lax.rsqrt(ms + eps) * g_ref[...]

    out_ref[...] = xn * (1.0 + scale) + shift


# ---------------- wrapper ----------------
def adaptive_layer_norm_final(x, emb, linear_w, linear_b, norm_w, *, eps=NORM_EPS):
    """x, emb: (B, S, D) f32; linear_w: (2D, D) torch layout; linear_b: (2D,); norm_w: (D,)."""
    B, S, D = x.shape
    R = B * S

    # Fold (B, S) -> rows; transpose the torch Linear weight to (D, 2D) (layout
    # plumbing on the host, negligible cost at these sizes).
    x2 = x.reshape(R, D)
    e2 = emb.reshape(R, D)
    w_t = linear_w.T
    b2 = linear_b.reshape(1, 2 * D)
    g2 = norm_w.reshape(1, D)

    # Row tiling: one grid step for small inputs, tiled "parallel" steps for big ones.
    row_tile = R if R <= MAX_ROW_TILE else MAX_ROW_TILE
    assert R % row_tile == 0, "B*S must be divisible by the row tile"
    grid = (R // row_tile,)

    rows_map = lambda i: (i, 0)     # x / emb / out walk the row axis
    rep_map = lambda i: (0, 0)      # weights stay resident in VMEM across steps

    out = pl.pallas_call(
        functools.partial(adaln_final_kernel, eps=eps),
        out_shape=jax.ShapeDtypeStruct((R, D), jnp.float32),
        grid=grid,
        in_specs=[
            pl.BlockSpec((row_tile, D), rows_map),   # x  (rows = B*S)
            pl.BlockSpec((row_tile, D), rows_map),   # emb
            pl.BlockSpec((D, 2 * D), rep_map),       # linear weight^T
            pl.BlockSpec((1, 2 * D), rep_map),       # linear bias
            pl.BlockSpec((1, D), rep_map),           # rmsnorm weight
        ],
        out_specs=pl.BlockSpec((row_tile, D), rows_map),
        compiler_params=pltpu.CompilerParams(
            dimension_semantics=("parallel",)),
    )(x2, e2, w_t, b2, g2)
    return out.reshape(B, S, D)


# ---------------- pure-JAX reference (mirrors the PyTorch forward) ----------------
def reference(x, emb, linear_w, linear_b, norm_w, eps=NORM_EPS):
    P = jax.lax.Precision.HIGHEST
    act = emb * jax.nn.sigmoid(emb)
    proj = jnp.einsum('bsd,ed->bse', act, linear_w, precision=P) + linear_b
    scale, shift = jnp.split(proj, 2, axis=-1)
    ms = jnp.mean(x * x, axis=-1, keepdims=True)
    xn = x * jax.lax.rsqrt(ms + eps) * norm_w
    return xn * (1.0 + scale) + shift


if __name__ == "__main__":
    key = jax.random.PRNGKey(0)
    ks = jax.random.split(key, 8)

    x = jax.random.normal(ks[0], (BATCH, SEQ, D_MODEL), jnp.float32)
    emb = jax.random.normal(ks[1], (BATCH, SEQ, D_MODEL), jnp.float32)

    # torch nn.Linear layout: weight = (out_features, in_features) = (2D, D)
    linear_w = 0.02 * jax.random.normal(ks[2], (2 * D_MODEL, D_MODEL), jnp.float32)
    linear_b = 0.02 * jax.random.normal(ks[3], (2 * D_MODEL,), jnp.float32)
    norm_w = 1.0 + 0.1 * jax.random.normal(ks[4], (D_MODEL,), jnp.float32)

    out = adaptive_layer_norm_final(x, emb, linear_w, linear_b, norm_w)
    out = jax.block_until_ready(out)

    ref = reference(x, emb, linear_w, linear_b, norm_w)
    ref = jax.block_until_ready(ref)

    assert out.shape == (BATCH, SEQ, D_MODEL)
    max_err = float(jnp.max(jnp.abs(out - ref)))
    if not np.isfinite(max_err) or max_err > 5e-4:
        raise AssertionError(f"mismatch vs reference, max abs err = {max_err}")
    print("KERNEL_OK")
</pallas_src>

<mosaic_0001>
module attributes {stable_mosaic.version = 11 : i64} {
  func.func @adaln_final_kernel(%arg0: i32, %arg1: memref<16x128xf32, #tpu.memory_space<vmem>>, %arg2: memref<16x128xf32, #tpu.memory_space<vmem>>, %arg3: memref<128x256xf32, #tpu.memory_space<vmem>>, %arg4: memref<1x256xf32, #tpu.memory_space<vmem>>, %arg5: memref<1x128xf32, #tpu.memory_space<vmem>>, %arg6: memref<16x128xf32, #tpu.memory_space<vmem>>) attributes {dimension_semantics = [#tpu.dimension_semantics<parallel>], iteration_bounds = array<i64: 1>, scalar_prefetch = 0 : i64, scratch_operands = 0 : i64, tpu.core_type = #tpu.core_type<tc>, window_params = [{transform_indices = @transform_0, window_bounds = array<i64: 16, 128>}, {transform_indices = @transform_1, window_bounds = array<i64: 16, 128>}, {pipeline_mode = #tpu.pipeline_mode<synchronous>, transform_indices = @transform_2, window_bounds = array<i64: 128, 256>}, {pipeline_mode = #tpu.pipeline_mode<synchronous>, transform_indices = @transform_3, window_bounds = array<i64: 1, 256>}, {pipeline_mode = #tpu.pipeline_mode<synchronous>, transform_indices = @transform_4, window_bounds = array<i64: 1, 128>}, {transform_indices = @transform_5, window_bounds = array<i64: 16, 128>}]} {
    %c0 = arith.constant 0 : index
    %c0_0 = arith.constant 0 : index
    %0 = vector.load %arg1[%c0, %c0_0] : memref<16x128xf32, #tpu.memory_space<vmem>>, vector<16x128xf32>
    %c0_1 = arith.constant 0 : index
    %c0_2 = arith.constant 0 : index
    %1 = vector.load %arg2[%c0_1, %c0_2] : memref<16x128xf32, #tpu.memory_space<vmem>>, vector<16x128xf32>
    %2 = arith.negf %1 : vector<16x128xf32>
    %3 = math.exp %2 : vector<16x128xf32>
    %cst = arith.constant 1.000000e+00 : f32
    %4 = vector.broadcast %cst : f32 to vector<16x128xf32>
    %5 = arith.addf %4, %3 : vector<16x128xf32>
    %6 = arith.divf %4, %5 : vector<16x128xf32>
    %7 = arith.mulf %1, %6 : vector<16x128xf32>
    %c0_3 = arith.constant 0 : index
    %c0_4 = arith.constant 0 : index
    %8 = vector.load %arg3[%c0_3, %c0_4] : memref<128x256xf32, #tpu.memory_space<vmem>>, vector<128x256xf32>
    %cst_5 = arith.constant dense<0.000000e+00> : vector<16x256xf32>
    %9 = tpu.matmul %7, %8, %cst_5 {dimension_numbers = #tpu.dot_dimension_numbers<[1], [0], [0], [1], [0, 0, 1, 1], [], []>} : vector<16x128xf32>, vector<128x256xf32>, vector<16x256xf32> -> vector<16x256xf32>
    %c0_6 = arith.constant 0 : index
    %c0_7 = arith.constant 0 : index
    %10 = vector.load %arg4[%c0_6, %c0_7] : memref<1x256xf32, #tpu.memory_space<vmem>>, vector<1x256xf32>
    %11 = vector.broadcast %10 : vector<1x256xf32> to vector<16x256xf32>
    %12 = arith.addf %9, %11 : vector<16x256xf32>
    %13 = vector.extract_strided_slice %12 {offsets = [0, 0], sizes = [16, 128], strides = [1, 1]} : vector<16x256xf32> to vector<16x128xf32>
    %14 = vector.extract_strided_slice %12 {offsets = [0, 128], sizes = [16, 128], strides = [1, 1]} : vector<16x256xf32> to vector<16x128xf32>
    %15 = arith.mulf %0, %0 : vector<16x128xf32>
    %cst_8 = arith.constant dense<0.000000e+00> : vector<16xf32>
    %16 = vector.multi_reduction <add>, %15, %cst_8 [1] : vector<16x128xf32> to vector<16xf32>
    %17 = vector.shape_cast %16 : vector<16xf32> to vector<16x1xf32>
    %cst_9 = arith.constant 1.280000e+02 : f32
    %18 = vector.broadcast %cst_9 : f32 to vector<16x1xf32>
    %19 = arith.divf %17, %18 : vector<16x1xf32>
    %cst_10 = arith.constant 9.99999974E-6 : f32
    %20 = vector.broadcast %cst_10 : f32 to vector<16x1xf32>
    %21 = arith.addf %19, %20 : vector<16x1xf32>
    %22 = math.rsqrt %21 : vector<16x1xf32>
    %23 = vector.broadcast %22 : vector<16x1xf32> to vector<16x128xf32>
    %24 = arith.mulf %0, %23 : vector<16x128xf32>
    %c0_11 = arith.constant 0 : index
    %c0_12 = arith.constant 0 : index
    %25 = vector.load %arg5[%c0_11, %c0_12] : memref<1x128xf32, #tpu.memory_space<vmem>>, vector<1x128xf32>
    %26 = vector.broadcast %25 : vector<1x128xf32> to vector<16x128xf32>
    %27 = arith.mulf %24, %26 : vector<16x128xf32>
    %cst_13 = arith.constant 1.000000e+00 : f32
    %28 = vector.broadcast %cst_13 : f32 to vector<16x128xf32>
    %29 = arith.addf %28, %13 : vector<16x128xf32>
    %30 = arith.mulf %27, %29 : vector<16x128xf32>
    %31 = arith.addf %30, %14 : vector<16x128xf32>
    %c0_14 = arith.constant 0 : index
    %c0_15 = arith.constant 0 : index
    %32 = vector.load %arg6[%c0_14, %c0_15] : memref<16x128xf32, #tpu.memory_space<vmem>>, vector<16x128xf32>
    tpu.vector_store %arg6[%c0_14, %c0_15], %31 {strides = array<i32>} : memref<16x128xf32, #tpu.memory_space<vmem>>, vector<16x128xf32>,
    return
  }
  func.func @transform_0(%arg0: i32) -> (i32, i32) {
    %c0_i32 = arith.constant 0 : i32
    %c0_i32_0 = arith.constant 0 : i32
    return %arg0, %c0_i32 : i32, i32
  }
  func.func @transform_1(%arg0: i32) -> (i32, i32) {
    %c0_i32 = arith.constant 0 : i32
    %c0_i32_0 = arith.constant 0 : i32
    return %arg0, %c0_i32 : i32, i32
  }
  func.func @transform_2(%arg0: i32) -> (i32, i32) {
    %c0_i32 = arith.constant 0 : i32
    %c0_i32_0 = arith.constant 0 : i32
    %c0_i32_1 = arith.constant 0 : i32
    return %c0_i32, %c0_i32_0 : i32, i32
  }
  func.func @transform_3(%arg0: i32) -> (i32, i32) {
    %c0_i32 = arith.constant 0 : i32
    %c0_i32_0 = arith.constant 0 : i32
    %c0_i32_1 = arith.constant 0 : i32
    return %c0_i32, %c0_i32_0 : i32, i32
  }
  func.func @transform_4(%arg0: i32) -> (i32, i32) {
    %c0_i32 = arith.constant 0 : i32
    %c0_i32_0 = arith.constant 0 : i32
    %c0_i32_1 = arith.constant 0 : i32
    return %c0_i32, %c0_i32_0 : i32, i32
  }
  func.func @transform_5(%arg0: i32) -> (i32, i32) {
    %c0_i32 = arith.constant 0 : i32
    %c0_i32_0 = arith.constant 0 : i32
    return %arg0, %c0_i32 : i32, i32
  }
}

</mosaic_0001>

<bundles_post_ra>
// kernel: tpu_custom_call.1
= control target key start
LH: loop header
LB: loop body
LE: loop exit
PB: predicated region body
PF: predicated region fallthrough
CT: control target
= control target key end

     0   :  { %10 = vsyncpa [#allocation3], 0  ;;  %s544_s0 = inlined_call_operand.hbm [shape: f32[16,128], index: 0, kind: input, shape index: {}]   ;;  %s545_s1 = inlined_call_operand.hbm [shape: f32[16,128], index: 1, kind: input, shape index: {}]   ;;  %s546_s2 = inlined_call_operand.hbm [shape: f32[128,256], index: 2, kind: input, shape index: {}]   ;;  %s547_s3 = inlined_call_operand.vmem [shape: f32[1,256], index: 3, kind: input, shape index: {}]   ;;  %s548_s4 = inlined_call_operand.vmem [shape: f32[1,128], index: 4, kind: input, shape index: {}]   ;;  %s549_s5 = inlined_call_operand.hbm [shape: f32[16,128], index: 5, kind: output, shape index: {}]  }
   0x1   :  { %11 = vsyncpa [#allocation6], 0 }
   0x2   :  { %12 = vsyncpa [#allocation4], 0  ;;  %s417_s18 = smov [#allocation5]   ;;  %s418_s20 = smov [#allocation2]  }
   0x3   :  { %s30_s19 = sshll.u32 %s417_s18, 4  ;;  %s18_s21 = sshll.u32 %s418_s20, 4  ;;  %s31_s19 = int_to_ptr.vmem [resolvable:$true] %s30_s19  ;;  %s456_s21 = int_to_ptr.vmem [resolvable:$true] %s18_s21 }
   0x4   :  { %s323_s24 = scalar_lea.hbm %s545_s1, 256 }
   0x5   :  { %p324_p0 = scmp.ne.s32.totalorder %s545_s1, %s323_s24  ;;  %p327_p1 = scmp.lt.u32.totalorder %s323_s24, %s545_s1 }
   0x7   :  { %p329_p2 = pnand %p327_p1, %p324_p0 }
   0x9   :  { %332 = shalt.err (!%p329_p2)
}
   0xa   :  { %s333_s29 = scalar_lea.vmem %s31_s19, 256  ;;  %p338_p4 = scmp.lt.s32.totalorder %s31_s19, %s31_s19 }
   0xb   :  { %p334_p3 = scmp.ne.s32.totalorder %s31_s19, %s333_s29  ;;  %p339_p5 = scmp.lt.s32.totalorder %s333_s29, %s333_s29 }
   0xd   :  { %p340_p6 = por %p339_p5, %p338_p4 }
   0xf   :  { %p341_p7 = pnand %p340_p6, %p334_p3 }
  0x11   :  { %344 = shalt.err (!%p341_p7)
}
  0x12   :  { %s419_s30 = smov 128   ;;  %s420_s6 = smov 8  }
  0x13   :  { %36 = dma.hbm_to_vmem [thread:$0]  %s545_s1, 256, %s31_s19, [#allocation6], %s419_s30, %s419_s30, %s420_s6  }
  0x14   :  { %s345_s11 = scalar_lea.hbm %s544_s0, 256 }
  0x15   :  { %p346_p8 = scmp.ne.s32.totalorder %s544_s0, %s345_s11  ;;  %p349_p9 = scmp.lt.u32.totalorder %s345_s11, %s544_s0 }
  0x17   :  { %p351_p10 = pnand %p349_p9, %p346_p8 }
  0x19   :  { %354 = shalt.err (!%p351_p10)
}
  0x1a   :  { %s355_s16 = scalar_lea.vmem %s456_s21, 256  ;;  %p360_p12 = scmp.lt.s32.totalorder %s456_s21, %s456_s21 }
  0x1b   :  { %p356_p11 = scmp.ne.s32.totalorder %s456_s21, %s355_s16  ;;  %p361_p13 = scmp.lt.s32.totalorder %s355_s16, %s355_s16 }
  0x1d   :  { %p362_p0 = por %p361_p13, %p360_p12 }
  0x1f   :  { %p363_p1 = pnand %p362_p0, %p356_p11 }
  0x21   :  { %366 = shalt.err (!%p363_p1)
}
  0x22   :  { %24 = dma.hbm_to_vmem [thread:$0]  %s544_s0, 256, %s456_s21, [#allocation3], %s419_s30, %s419_s30, %s420_s6  }
  0x23   :  { %s421_s18 = smov [#allocation7]   ;;  %s367_s23 = scalar_lea.hbm %s546_s2, 4096 }
  0x24   :  { %s42_s19 = sshll.u32 %s421_s18, 4  ;;  %p368_p2 = scmp.ne.s32.totalorder %s546_s2, %s367_s23  ;;  %s43_s19 = int_to_ptr.vmem [resolvable:$true] %s42_s19 }
  0x25   :  { %p371_p3 = scmp.lt.u32.totalorder %s367_s23, %s546_s2 }
  0x27   :  { %p373_p4 = pnand %p371_p3, %p368_p2 }
  0x29   :  { %376 = shalt.err (!%p373_p4)
}
  0x2a   :  { %s377_s28 = scalar_lea.vmem %s43_s19, 4096  ;;  %p382_p6 = scmp.lt.s32.totalorder %s43_s19, %s43_s19 }
  0x2b   :  { %p378_p5 = scmp.ne.s32.totalorder %s43_s19, %s377_s28  ;;  %p383_p7 = scmp.lt.s32.totalorder %s377_s28, %s377_s28 }
  0x2d   :  { %p384_p8 = por %p383_p7, %p382_p6 }
  0x2f   :  { %p385_p9 = pnand %p384_p8, %p378_p5 }
  0x31   :  { %388 = shalt.err (!%p385_p9)
}
  0x32   :  { %s422_s0 = smov 256   ;;  %s423_s21 = smov 16  }
  0x33   :  { %48 = dma.hbm_to_vmem [thread:$0]  %s546_s2, 4096, %s43_s19, [#allocation6], %s422_s0, %s422_s0, %s423_s21  }
  0x34   :  { %411 = dma.done.wait [#allocation3], 256  }
  0x35   :  { %412 = vsyncadd [#allocation3], 4294967040 }
  0x36   :  { %413 = dma.done.wait [#allocation6], 4352  }
  0x37   :  { %414 = vsyncadd [#allocation6], 4294962944  ;;  %v424_v0 = vmov 0.0   ;;  %v81_v1 = vld [vmem:[#allocation7 + $0x8] sm:$0xff]  ;;  %v83_v2 = vld [vmem:[#allocation7 + $0x18] sm:$0xff] }
  0x38   :  { %188 = vmatprep.mubr.f32.mxu0 %v424_v0  ;;  %194 = vmatprep.mubr.f32.mxu1 %v424_v0  ;;  %v80_v3 = vld [vmem:[#allocation7] sm:$0xff]  ;;  %v254_v4 = vpack.c.bf16 %v83_v2, %v81_v1  ;;  %v82_v5 = vld [vmem:[#allocation7 + $0x10] sm:$0xff]  ;;  %v85_v6 = vld [vmem:[#allocation7 + $0x28] sm:$0xff] }
  0x39   :  { %v87_v7 = vld [vmem:[#allocation7 + $0x38] sm:$0xff]  ;;  %v256_v8 = vpack.c.bf16 %v82_v5, %v80_v3  ;;  %v84_v10 = vld [vmem:[#allocation7 + $0x20] sm:$0xff]  ;;  %v86_v11 = vld [vmem:[#allocation7 + $0x30] sm:$0xff] }
  0x3a   :  { %v258_v9 = vpack.c.bf16 %v87_v7, %v85_v6  ;;  %v89_v12 = vld [vmem:[#allocation7 + $0x48] sm:$0xff]  ;;  %255 = vmatprep.subr.bf16.mxu0 %v254_v4  ;;  %286 = vmatprep.subr.bf16.mxu1 %v254_v4  ;;  %v91_v13 = vld [vmem:[#allocation7 + $0x58] sm:$0xff]  ;;  %v260_v14 = vpack.c.bf16 %v86_v11, %v84_v10  ;;  %v88_v16 = vld [vmem:[#allocation7 + $0x40] sm:$0xff]  ;;  %v114_v7 = vlaneseq }
  0x3b   :  { %257 = vmatpush1.bf16.msra.mxu0 %v256_v8  ;;  %294 = vmatpush1.bf16.msra.mxu1 %v256_v8  ;;  %v262_v15 = vpack.c.bf16 %v91_v13, %v89_v12  ;;  %v90_v17 = vld [vmem:[#allocation7 + $0x50] sm:$0xff]  ;;  %v93_v18 = vld [vmem:[#allocation7 + $0x68] sm:$0xff]  ;;  %v95_v19 = vld [vmem:[#allocation7 + $0x78] sm:$0xff] }
  0x3c   :  { %259 = vmatprep.subr.bf16.mxu0 %v258_v9  ;;  %287 = vmatprep.subr.bf16.mxu1 %v258_v9  ;;  %v264_v20 = vpack.c.bf16 %v90_v17, %v88_v16  ;;  %v266_v21 = vpack.c.bf16 %v95_v19, %v93_v18  ;;  %v92_v22 = vld [vmem:[#allocation7 + $0x60] sm:$0xff]  ;;  %v94_v23 = vld [vmem:[#allocation7 + $0x70] sm:$0xff]  ;;  %v97_v24 = vld [vmem:[#allocation7 + $0x88] sm:$0xff]  ;;  %v115_v8 = vshrl.u32 %v114_v7, 7 }
  0x3d   :  { %v99_v25 = vld [vmem:[#allocation7 + $0x98] sm:$0xff]  ;;  %v505_v26 = vld [vmem:[#allocation5] sm:$0xff]  ;;  %v510_v29 = vld [vmem:[#allocation2] sm:$0xff]  ;;  %v268_v31 = vpack.c.bf16 %v94_v23, %v92_v22 }
  0x3e   :  { %v251_v27 = vmul.f32 -1.442695, %v505_v26  ;;  %v508_v28 = vld [vmem:[#allocation5 + $0x8] sm:$0xff]  ;;  %v512_v30 = vld [vmem:[#allocation2 + $0x8] sm:$0xff]  ;;  %v201_v33 = vmul.f32 %v510_v29, %v510_v29  ;;  %v270_v34 = vpack.c.bf16 %v99_v25, %v97_v24  ;;  %v96_v35 = vld [vmem:[#allocation7 + $0x80] sm:$0xff]  ;;  %v116_v9 = vsub.s32 0, %v115_v8 }
  0x3f   :  { %261 = vmatpush1.bf16.msra.mxu0 %v260_v14  ;;  %295 = vmatpush1.bf16.msra.mxu1 %v260_v14  ;;  %v252_v32 = vmul.f32 -1.442695, %v508_v28  ;;  %v98_v36 = vld [vmem:[#allocation7 + $0x90] sm:$0xff]  ;;  %v101_v37 = vld [vmem:[#allocation7 + $0xa8] sm:$0xff]  ;;  %v103_v38 = vld [vmem:[#allocation7 + $0xb8] sm:$0xff]  ;;  %v202_v39 = vmul.f32 %v512_v30, %v512_v30  ;;  %v120_v14 = vsub.s32 1, %v115_v8 }
  0x40   :  { %263 = vmatprep.subr.bf16.mxu0 %v262_v15  ;;  %288 = vmatprep.subr.bf16.mxu1 %v262_v15  ;;  %311 = vpow2.f32 %v251_v27  ;;  %v272_v40 = vpack.c.bf16 %v98_v36, %v96_v35  ;;  %v274_v41 = vpack.c.bf16 %v103_v38, %v101_v37  ;;  %v100_v42 = vld [vmem:[#allocation7 + $0xa0] sm:$0xff]  ;;  %v102_v43 = vld [vmem:[#allocation7 + $0xb0] sm:$0xff]  ;;  %v105_v44 = vld [vmem:[#allocation7 + $0xc8] sm:$0xff] }
  0x41   :  { %313 = vpow2.f32 %v252_v32  ;;  %203 = vadd.xlane.f32.xlu0 %v201_v33  ;;  %v107_v45 = vld [vmem:[#allocation7 + $0xd8] sm:$0xff]  ;;  %v276_v46 = vpack.c.bf16 %v102_v43, %v100_v42  ;;  %v104_v48 = vld [vmem:[#allocation7 + $0xc0] sm:$0xff]  ;;  %v106_v49 = vld [vmem:[#allocation7 + $0xd0] sm:$0xff] }
  0x42   :  { %v278_v47 = vpack.c.bf16 %v107_v45, %v105_v44  ;;  %v109_v50 = vld [vmem:[#allocation7 + $0xe8] sm:$0xff]  ;;  %v111_v51 = vld [vmem:[#allocation7 + $0xf8] sm:$0xff]  ;;  %v280_v54 = vpack.c.bf16 %v106_v49, %v104_v48  ;;  %v108_v57 = vld [vmem:[#allocation7 + $0xe0] sm:$0xff] }
  0x43   :  { %265 = vmatpush1.bf16.msra.mxu0 %v264_v20  ;;  %296 = vmatpush1.bf16.msra.mxu1 %v264_v20  ;;  %v282_v56 = vpack.c.bf16 %v111_v51, %v109_v50  ;;  %v110_v58 = vld [vmem:[#allocation7 + $0xf0] sm:$0xff]  ;;  %v112_v10 = vld [vmem:[%s547_s3] sm:$0x3]  ;;  %s425_s3 = smov [#allocation8]  }
  0x44   :  { %267 = vmatprep.subr.bf16.mxu0 %v266_v21  ;;  %289 = vmatprep.subr.bf16.mxu1 %v266_v21  ;;  %v284_v60 = vpack.c.bf16 %v110_v58, %v108_v57  ;;  %v117_v13 = vrot.slane %v112_v10, %v116_v9  ;;  %v253_v18 = vld [vmem:[%s548_s4] ss:$0 sm:$0xff]  ;;  %v121_v21 = vrot.slane %v112_v10, %v120_v14  ;;  %s238_s11 = sshll.u32 %s425_s3, 4  ;;  %s239_s11 = int_to_ptr.vmem [resolvable:$true] %s238_s11 }
  0x45   :  { %205 = vadd.xlane.f32.xlu0 %v202_v39  ;;  %s389_s4 = scalar_lea.vmem %s239_s11, 256  ;;  %p394_p11 = scmp.lt.s32.totalorder %s239_s11, %s239_s11 }
  0x46   :  { %p390_p10 = scmp.ne.s32.totalorder %s239_s11, %s389_s4  ;;  %p395_p12 = scmp.lt.s32.totalorder %s389_s4, %s389_s4 }
  0x47   :  { %269 = vmatpush1.bf16.msra.mxu0 %v268_v31  ;;  %297 = vmatpush1.bf16.msra.mxu1 %v268_v31 }
  0x48   :  { %271 = vmatprep.subr.bf16.mxu0 %v270_v34  ;;  %290 = vmatprep.subr.bf16.mxu1 %v270_v34  ;;  %p396_p13 = por %p395_p12, %p394_p11 }
  0x4a   :  { %v312_v52 = vpop.eup %311  ;;  %p397_p0 = pnand %p396_p13, %p390_p10 }
  0x4b   :  { %273 = vmatpush1.bf16.msra.mxu0 %v272_v40  ;;  %298 = vmatpush1.bf16.msra.mxu1 %v272_v40  ;;  %v314_v53 = vpop.eup %313  ;;  %v72_v55 = vadd.f32 1.0, %v312_v52 }
  0x4c   :  { %275 = vmatprep.subr.bf16.mxu0 %v274_v41  ;;  %291 = vmatprep.subr.bf16.mxu1 %v274_v41  ;;  %v73_v59 = vadd.f32 1.0, %v314_v53 }
  0x4d   :  { %315 = vrcp.f32 %v72_v55 }
  0x4e   :  { %317 = vrcp.f32 %v73_v59 }
  0x4f   :  { %277 = vmatpush1.bf16.msra.mxu0 %v276_v46  ;;  %299 = vmatpush1.bf16.msra.mxu1 %v276_v46 }
  0x50   :  { %279 = vmatprep.subr.bf16.mxu0 %v278_v47  ;;  %292 = vmatprep.subr.bf16.mxu1 %v278_v47 }
  0x53   :  { %281 = vmatpush1.bf16.msra.mxu0 %v280_v54  ;;  %300 = vmatpush1.bf16.msra.mxu1 %v280_v54 }
  0x54   :  { %283 = vmatprep.subr.bf16.mxu0 %v282_v56  ;;  %293 = vmatprep.subr.bf16.mxu1 %v282_v56 }
  0x57   :  { %285 = vmatpush1.bf16.msra.mxu0 %v284_v60  ;;  %301 = vmatpush1.bf16.msra.mxu1 %v284_v60  ;;  %v316_v61 = vpop.eup %315 }
  0x58   :  { %v318_v62 = vpop.eup %317  ;;  %v78_v63 = vmul.f32 %v316_v61, %v505_v26 }
  0x59   :  { %v79_v0 = vmul.f32 %v318_v62, %v508_v28 }
  0x5a   :  { %189 = vmatmul.mubr.f32.vlgmr.msra.gmra.mrb[0].mxu0 %v78_v63 }
  0x5b   :  { %195 = vmatmul.mubr.f32.vlgmr.msra.gmra.mrb[0].mxu1 %v79_v0 }
  0xce   :  { %v204_v1 = vpop.xlane.xlu0 %203 }
  0xcf   :  { %v208_v4 = vmul.f32 0.0078125, %v204_v1 }
  0xd1   :  { %v210_v6 = vadd.f32 1e-05, %v208_v4 }
  0xd2   :  { %v206_v2 = vpop.xlane.xlu0 %205 }
  0xd3   :  { %v209_v3 = vmul.f32 0.0078125, %v206_v2 }
  0xd5   :  { %v211_v5 = vadd.f32 1e-05, %v209_v3 }
  0xd7   :  { %319 = vrsqrt.f32 %v211_v5 }
  0xd8   :  { %321 = vrsqrt.f32 %v210_v6 }
  0xe1   :  { %v320_v11 = vpop.eup %319 }
  0xe2   :  { %v322_v12 = vpop.eup %321  ;;  %v215_v15 = vmul.f32 %v320_v11, %v512_v30 }
  0xe3   :  { %v214_v16 = vmul.f32 %v322_v12, %v510_v29 }
  0xe4   :  { %v224_v24 = vmul.f32 %v253_v18, %v215_v15 }
  0xe5   :  { %v223_v26 = vmul.f32 %v253_v18, %v214_v16 }
 0x12d   :  { %v190_v17 = vpop.f32.mrb[0].mxu0 }
 0x12e   :  { %v191_v19 = vadd.f32 %v190_v17, %v117_v13  ;;  %v196_v20 = vpop.f32.mrb[0].mxu1  ;;  %v192_v22 = vpop.f32.mrb[1].mxu0 }
 0x12f   :  { %v197_v23 = vadd.f32 %v196_v20, %v117_v13  ;;  %v198_v25 = vpop.f32.mrb[1].mxu1  ;;  %v193_v32 = vadd.f32 %v192_v22, %v121_v21 }
 0x130   :  { %v225_v27 = vadd.f32 1.0, %v191_v19  ;;  %v199_v30 = vadd.f32 %v198_v25, %v121_v21 }
 0x131   :  { %v226_v28 = vadd.f32 1.0, %v197_v23 }
 0x132   :  { %v227_v31 = vmul.f32 %v225_v27, %v223_v26 }
 0x133   :  { %v228_v29 = vmul.f32 %v226_v28, %v224_v24 }
 0x134   :  { %v229_v33 = vadd.f32 %v227_v31, %v193_v32 }
 0x135   :  { %v230_v34 = vadd.f32 %v228_v29, %v199_v30 }
 0x136   :  { %231 = vst [vmem:[#allocation8] sm:$0xff] %v229_v33 }
 0x137   :  { %232 = vst [vmem:[#allocation8 + $0x8] sm:$0xff] %v230_v34 }
 0x138   :  { %400 = shalt.err (!%p397_p0)
}
 0x139   :  { %s401_s14 = scalar_lea.hbm %s549_s5, 256 }
 0x13a   :  { %p402_p1 = scmp.ne.s32.totalorder %s549_s5, %s401_s14  ;;  %p405_p2 = scmp.lt.u32.totalorder %s401_s14, %s549_s5 }
 0x13c   :  { %p407_p3 = pnand %p405_p2, %p402_p1 }
 0x13e   :  { %410 = shalt.err (!%p407_p3)
}
 0x13f   :  { %244 = dma.vmem_to_hbm [thread:$0]  %s239_s11, 256, %s549_s5, [#allocation4], %s419_s30, %s419_s30, %s420_s6  }
 0x140   :  { %415 = dma.done.wait [#allocation4], 256  }
 0x141   :  { %416 = vsyncadd [#allocation4], 4294967040 }
 0x142   :  { %248 = vsyncpa [#allocation3], 1 }
 0x143   :  { %249 = vsyncpa [#allocation6], 1 }
 0x144   :  { %250 = vsyncpa [#allocation4], 1 }

</bundles_post_ra>
